<compile_context>
chip_gen: v5e
topology: v5e:2x2
jax: 0.10.0
libtpu: 0.0.40
codegen_flags: <defaults>
</compile_context>

<pallas_src>
import jax
import jax.numpy as jnp
from jax.experimental import pallas as pl
from jax.experimental.pallas import tpu as pltpu


def _round_up(x, m):
    return (x + m - 1) // m * m


# ---------------------------------------------------------------------------
# Pallas kernel: label scores = sigmoid(logits_rows) @ normalized_pos_map.T
#   x_ref  : (tm, T)   logits (rows = flattened batch*query), native dtype
#   pm_ref : (T, Lp)   bf16 normalized positive map, transposed, lane-padded
#   out_ref: (tm, Lp)  f32 scores
# ---------------------------------------------------------------------------
def _prob_to_label_kernel(x_ref, pm_ref, out_ref):
    # sigmoid in f32 on the EUP (no bf16 EUP on v5e), bf16 operands for the
    # MXU, accumulation stays in f32 (preferred_element_type).
    prob = jax.nn.sigmoid(x_ref[...].astype(jnp.float32)).astype(jnp.bfloat16)
    out_ref[...] = jnp.dot(prob, pm_ref[...],
                           preferred_element_type=jnp.float32)


def prob_to_label(out_logits, pm_norm_t, row_tile=1024):
    """sigmoid(out_logits) @ pm_norm_t -> (B, Q, Lp) float32 label scores."""
    B, Q, T = out_logits.shape
    Lp = pm_norm_t.shape[1]
    R = B * Q

    # Row tile: as large as is useful (mem-bound sweep: 512/1024-row tiles hit
    # ~85% of HBM roofline vs ~63% at 256; VMEM is ~3 MiB at tm=1024, far
    # under every generation's limit), but capped so the "parallel" grid keeps
    # at least 2 row blocks for v7x's two TensorCores.
    sub = 8 if out_logits.dtype.itemsize >= 4 else 16   # sublane multiple
    tm = max(sub, min(row_tile, _round_up(pl.cdiv(R, 2), sub)))

    # No wrapper-side dtype upcast, no row padding, no trailing slice: each is
    # an extra full HBM pass on a bandwidth-bound path.  The ragged last row
    # block (if any) is masked by Pallas on writeback; garbage rows in the
    # input tile cannot leak because the matmul is row-wise.
    x = out_logits.reshape(R, T)

    out = pl.pallas_call(
        _prob_to_label_kernel,
        out_shape=jax.ShapeDtypeStruct((R, Lp), jnp.float32),
        grid=(pl.cdiv(R, tm),),
        in_specs=[
            pl.BlockSpec((tm, T), lambda i: (i, 0)),
            pl.BlockSpec((T, Lp), lambda i: (0, 0)),   # grid-invariant weights
        ],
        out_specs=pl.BlockSpec((tm, Lp), lambda i: (i, 0)),
        compiler_params=pltpu.CompilerParams(
            dimension_semantics=("parallel",)),
    )(x, pm_norm_t)

    return out.reshape(B, Q, Lp)


# ---------------------------------------------------------------------------
# Hoisted (can be precomputed once per caption): per-label row normalization
# with the torch `if sum != 0` guard, transpose to (T, L), bf16 cast, and
# zero-padding of the label axis to a multiple of 128 (lane-dense MXU tiles /
# stores).  L <= 128 stays at Lp = 128 (wider N adds write bytes for no gain).
# ---------------------------------------------------------------------------
def normalize_positive_map(pos_map, lane=128):
    L, T = pos_map.shape
    pos_map = pos_map.astype(jnp.float32)
    sums = pos_map.sum(axis=1, keepdims=True)
    pm = jnp.where(sums != 0.0,
                   pos_map / jnp.where(sums == 0.0, 1.0, sums),
                   pos_map)
    Lp = _round_up(max(L, lane), lane)
    pm_t = jnp.zeros((T, Lp), dtype=jnp.bfloat16)
    pm_t = pm_t.at[:, :L].set(pm.T.astype(jnp.bfloat16))
    return pm_t


# ---------------------------------------------------------------------------
# PostProcess.forward (not_to_xyxy=False, nms_iou_threshold<=0 path)
# ---------------------------------------------------------------------------
def post_process(out_logits, out_bbox, target_sizes, pos_map, num_select,
                 pm_norm_t=None):
    B, Q, T = out_logits.shape

    if pm_norm_t is None:
        pm_norm_t = normalize_positive_map(pos_map)       # (T, Lp) bf16
    Lp = pm_norm_t.shape[1]

    prob = prob_to_label(out_logits, pm_norm_t)           # (B, Q, Lp) f32

    # top-k directly on the lane-padded (query, label) grid; padded label
    # columns and all-zero positive_map rows score exactly 0.0 so real labels
    # always win the tie-break.  (Guard: num_select must not exceed the number
    # of nonzero-scored (query, label) entries, as in the torch module.)
    # TODO(synk): torch.topk has no clean Pallas sort primitive; jax.lax.top_k.
    flat = prob.reshape(B, Q * Lp)
    scores, topk_idx = jax.lax.top_k(flat, num_select)     # (B, num_select)
    topk_boxes = topk_idx // Lp
    labels = topk_idx % Lp

    # Gather the selected boxes first, then do cxcywh->xyxy + per-image scaling
    # on only num_select rows (conversion/scaling commute with the gather).
    # This is (B, num_select, 4) of VPU-trivial work — intentionally plain JAX.
    gather_idx = jnp.broadcast_to(topk_boxes[:, :, None], (B, num_select, 4))
    sel = jnp.take_along_axis(out_bbox, gather_idx, axis=1)
    cxcy, wh = sel[..., :2], sel[..., 2:]
    boxes = jnp.concatenate([cxcy - 0.5 * wh, cxcy + 0.5 * wh], axis=-1)

    img_h = target_sizes[:, 0].astype(jnp.float32)
    img_w = target_sizes[:, 1].astype(jnp.float32)
    scale_fct = jnp.stack([img_w, img_h, img_w, img_h], axis=1)[:, None, :]
    boxes = boxes * scale_fct
    return scores, labels, boxes


# ---------------------------------------------------------------------------
# Deterministic synthetic positive map (stands in for the tokenizer-built map)
# ---------------------------------------------------------------------------
def make_positive_map(num_labels, num_tokens=256):
    pm = jnp.zeros((num_labels, num_tokens), dtype=jnp.float32)
    for j in range(num_labels - 1):  # leave last label empty -> sum==0 branch
        start = 2 + 3 * j
        pm = pm.at[j, start:start + 2].set(1.0)
    return pm


# ---------------------------------------------------------------------------
# Pure-JAX reference (mirrors the torch forward; matmul precision matches the
# kernel's bf16 operands / f32 accumulation, and top_k uses the un-padded L so
# the padded-Lp kernel path is validated against the original semantics)
# ---------------------------------------------------------------------------
def post_process_ref(out_logits, out_bbox, target_sizes, pos_map, num_select):
    B, Q, T = out_logits.shape
    L = pos_map.shape[0]
    sums = pos_map.sum(axis=1, keepdims=True)
    pm = jnp.where(sums != 0, pos_map / jnp.where(sums == 0, 1.0, sums), pos_map)
    prob_tok = jax.nn.sigmoid(out_logits.astype(jnp.float32)).astype(jnp.bfloat16)
    prob = jnp.einsum("bqt,lt->bql", prob_tok, pm.astype(jnp.bfloat16),
                      preferred_element_type=jnp.float32)
    flat = prob.reshape(B, Q * L)
    scores, idx = jax.lax.top_k(flat, num_select)
    topk_boxes = idx // L
    labels = idx % L
    cxcy, wh = out_bbox[..., :2], out_bbox[..., 2:]
    boxes_all = jnp.concatenate([cxcy - 0.5 * wh, cxcy + 0.5 * wh], axis=-1)
    boxes = jnp.take_along_axis(
        boxes_all,
        jnp.broadcast_to(topk_boxes[:, :, None], (B, num_select, 4)), axis=1)
    img_h, img_w = target_sizes[:, 0], target_sizes[:, 1]
    scale_fct = jnp.stack([img_w, img_h, img_w, img_h], axis=1)
    boxes = boxes * scale_fct[:, None, :]
    return scores, labels, boxes


if __name__ == "__main__":
    key = jax.random.PRNGKey(0)
    B, Q, T, L = 2, 16, 256, 8
    num_select = 10

    k1, k2 = jax.random.split(key, 2)
    out_logits = jax.random.normal(k1, (B, Q, T), dtype=jnp.float32)
    out_bbox = jax.random.uniform(k2, (B, Q, 4), dtype=jnp.float32,
                                  minval=0.1, maxval=0.6)
    target_sizes = jnp.array([[480.0, 640.0], [600.0, 800.0]], dtype=jnp.float32)
    pos_map = make_positive_map(L, T)

    # Hoisted once (static caption/label list in the torch module).
    pm_norm_t = normalize_positive_map(pos_map)

    scores, labels, boxes = post_process(out_logits, out_bbox, target_sizes,
                                         pos_map, num_select,
                                         pm_norm_t=pm_norm_t)
    jax.block_until_ready((scores, labels, boxes))

    s_ref, l_ref, b_ref = post_process_ref(out_logits, out_bbox, target_sizes,
                                           pos_map, num_select)
    assert scores.shape == (B, num_select)
    assert labels.shape == (B, num_select)
    assert boxes.shape == (B, num_select, 4)
    assert jnp.allclose(scores, s_ref, atol=1e-5, rtol=1e-5), \
        float(jnp.max(jnp.abs(scores - s_ref)))
    assert jnp.array_equal(labels, l_ref)
    assert jnp.allclose(boxes, b_ref, atol=1e-4, rtol=1e-5)

    print("KERNEL_OK")
</pallas_src>

<mosaic_0001>
module attributes {stable_mosaic.version = 11 : i64} {
  func.func @_prob_to_label_kernel(%arg0: i32, %arg1: memref<16x256xf32, #tpu.memory_space<vmem>>, %arg2: memref<256x128xbf16, #tpu.memory_space<vmem>>, %arg3: memref<16x128xf32, #tpu.memory_space<vmem>>) attributes {dimension_semantics = [#tpu.dimension_semantics<parallel>], iteration_bounds = array<i64: 2>, scalar_prefetch = 0 : i64, scratch_operands = 0 : i64, tpu.core_type = #tpu.core_type<tc>, window_params = [{transform_indices = @transform_0, window_bounds = array<i64: 16, 256>}, {pipeline_mode = #tpu.pipeline_mode<synchronous>, transform_indices = @transform_1, window_bounds = array<i64: 256, 128>}, {transform_indices = @transform_2, window_bounds = array<i64: 16, 128>}]} {
    %c0 = arith.constant 0 : index
    %c0_0 = arith.constant 0 : index
    %0 = vector.load %arg1[%c0, %c0_0] : memref<16x256xf32, #tpu.memory_space<vmem>>, vector<16x256xf32>
    %1 = arith.negf %0 : vector<16x256xf32>
    %2 = math.exp %1 : vector<16x256xf32>
    %cst = arith.constant 1.000000e+00 : f32
    %3 = vector.broadcast %cst : f32 to vector<16x256xf32>
    %4 = arith.addf %3, %2 : vector<16x256xf32>
    %5 = arith.divf %3, %4 : vector<16x256xf32>
    %6 = arith.truncf %5 : vector<16x256xf32> to vector<16x256xbf16>
    %c0_1 = arith.constant 0 : index
    %c0_2 = arith.constant 0 : index
    %7 = vector.load %arg2[%c0_1, %c0_2] : memref<256x128xbf16, #tpu.memory_space<vmem>>, vector<256x128xbf16>
    %cst_3 = arith.constant dense<0.000000e+00> : vector<16x128xf32>
    %8 = tpu.matmul %6, %7, %cst_3 {dimension_numbers = #tpu.dot_dimension_numbers<[1], [0], [0], [1], [0, 0, 1, 1], [], []>} : vector<16x256xbf16>, vector<256x128xbf16>, vector<16x128xf32> -> vector<16x128xf32>
    %c0_4 = arith.constant 0 : index
    %c0_5 = arith.constant 0 : index
    %9 = vector.load %arg3[%c0_4, %c0_5] : memref<16x128xf32, #tpu.memory_space<vmem>>, vector<16x128xf32>
    tpu.vector_store %arg3[%c0_4, %c0_5], %8 {strides = array<i32>} : memref<16x128xf32, #tpu.memory_space<vmem>>, vector<16x128xf32>,
    return
  }
  func.func @transform_0(%arg0: i32) -> (i32, i32) {
    %c0_i32 = arith.constant 0 : i32
    %c0_i32_0 = arith.constant 0 : i32
    return %arg0, %c0_i32 : i32, i32
  }
  func.func @transform_1(%arg0: i32) -> (i32, i32) {
    %c0_i32 = arith.constant 0 : i32
    %c0_i32_0 = arith.constant 0 : i32
    %c0_i32_1 = arith.constant 0 : i32
    return %c0_i32, %c0_i32_0 : i32, i32
  }
  func.func @transform_2(%arg0: i32) -> (i32, i32) {
    %c0_i32 = arith.constant 0 : i32
    %c0_i32_0 = arith.constant 0 : i32
    return %arg0, %c0_i32 : i32, i32
  }
}

</mosaic_0001>

<bundles_post_ra>
// kernel: tpu_custom_call.1
= control target key start
LH: loop header
LB: loop body
LE: loop exit
PB: predicated region body
PF: predicated region fallthrough
CT: control target
= control target key end

     0   :  { %7 = vsyncpa [#allocation3], 0  ;;  %s1038_s0 = inlined_call_operand.hbm [shape: f32[32,256], index: 0, kind: input, shape index: {}]   ;;  %s1039_s1 = inlined_call_operand.hbm [shape: bf16[256,128], index: 1, kind: input, shape index: {}]   ;;  %s1040_s2 = inlined_call_operand.hbm [shape: f32[32,128], index: 2, kind: output, shape index: {}]  }
   0x1   :  { %9 = vsyncpa [#allocation3 + $0x1], 0 }
   0x2   :  { %10 = vsyncpa [#allocation6], 0 }
   0x3   :  { %11 = vsyncpa [#allocation4], 0 }
   0x4   :  { %13 = vsyncpa [#allocation4 + $0x1], 0  ;;  %s860_s9 = smov 0   ;;  %s862_s10 = smov 0  }
   0x5   :  { %s864_s11 = smov 0   ;;  %s866_s12 = smov 0  }
   0x6 LB: > { %s881_s13 = sadd.s32 4294967295, %s836_s12   ;;  %s523_s14 = sadd.s32 4294967294, %s836_s12   ;;  %s836_s12 = sphi %s866_s12, %s1058_s12   ;;  %s832_s11 = sphi %s864_s11, %s1057_s11   ;;  %s828_s10 = sphi %s862_s10, %s1056_s10   ;;  %s824_s9 = sphi %s860_s9, %s1055_s9  }
   0x7   : > { %p39_p0 = scmp.ne.s32.totalorder %s828_s10, %s824_s9  ;;  %p40_p1 = scmp.eq.s32.totalorder %s881_s13, 0 }
   0x8   : > { %p84_p2 = scmp.eq.s32.totalorder %s881_s13, 1  ;;  %p90_p3 = scmp.eq.s32.totalorder %s523_s14, 1 }
   0x9   : > { %p890_p4 = por %p40_p1, %p39_p0  ;;  %p524_p5 = scmp.ge.s32.totalorder %s836_s12, 1 }
   0xa   : > { %p895_p6 = por %p90_p3, %p39_p0  ;;  %p97_p7 = scmp.lt.s32.totalorder %s836_s12, 3 }
   0xb   : > { %s108_s19 = sshll.u32 %s1039_s1, 4  ;;  %s838_s21 = smov [#allocation5]   ;;  %s109_s19 = int_to_ptr.hbm [resolvable:$true] %s108_s19 }
   0xc   : > { %p903_p8 = pnand %p524_p5, %p97_p7  ;;  %s110_s22 = sshll.u32 %s838_s21, 4  ;;  %s111_s22 = int_to_ptr.vmem [resolvable:$true] %s110_s22 }
   0xd   : > { %s913_s23 = sadd.s32 1, %s836_s12   ;;  %s839_s24 = smov 64  }
   0xe   : > { %p635_p9 = pneg %p903_p8  ;;  %s840_s25 = smov 4  }
   0xf   : > { %s23_s26 = ssub.s32 %s836_s12, %s913_s23  ;;  %s26_s27 = sadd.s32 1, %s832_s11 }
  0x10   : > { %p636_p10 = pnand %p635_p9, %p40_p1  ;;  %p24_p12 = scmp.eq.s32.totalorder %s23_s26, 0 }
  0x11   : > { %p33_p13 = scmp.ne.s32.totalorder %s832_s11, %s828_s10  ;;  %p34_p0 = scmp.eq.s32.totalorder %s836_s12, 0 }
  0x12   : > { %638 = dma.hbm_to_vmem [thread:$0]  (!%p636_p10), %s109_s19, 2048, %s111_s22, [#allocation6], %s839_s24, %s839_s24, %s840_s25  }
  0x13   : > { %p648_p3 = scmp.lt.s32.totalorder %s836_s12, 2  ;;  %p35_p5 = por %p34_p0, %p33_p13 }
  0x14   : > { %s923_s28 = scalar_select %p24_p12, %s832_s11, %s26_s27  }
  0x15   : > { %p927_p7 = por %p84_p2, %p33_p13  ;;  %s124_s30 = sand.u32 1, %s832_s11  }
  0x16   : > { %s609_s3 = sshll.u32 %s836_s12, 5  ;;  %s527_s4 = sshll.u32 %s124_s30, 5 }
  0x17   : > { %s134_s7 = scalar_lea.hbm %s1038_s0, %s609_s3  ;;  %s128_s14 = scalar_lea.vmem [#allocation2], %s527_s4 }
  0x18   : > { %s135_s8 = sshll.u32 %s134_s7, 4  ;;  %s137_s17 = sshll.u32 %s128_s14, 4  ;;  %s136_s8 = int_to_ptr.hbm [resolvable:$true] %s135_s8  ;;  %s138_s17 = int_to_ptr.vmem [resolvable:$true] %s137_s17 }
  0x19   : > { %p938_p9 = pnand %p648_p3, %p35_p5  ;;  %s125_s19 = scalar_lea.sflag [#allocation3], %s124_s30 }
  0x1a   : > { %s736_s21 = sshra.s32 %s136_s8, 4  ;;  %s743_s26 = scalar_lea.hbm %s1038_s0, 64  ;;  %s737_s21 = int_to_ptr.hbm [resolvable:$true] %s736_s21 }
  0x1b   : > { %s738_s22 = scalar_lea.hbm %s737_s21, 32  ;;  %p740_p10 = pneg %p938_p9 }
  0x1c   : > { %p739_p2 = scmp.ne.s32.totalorder %s737_s21, %s738_s22  ;;  %p744_p0 = scmp.lt.s32.totalorder %s737_s21, %s1038_s0 }
  0x1d   : > { %p745_p3 = scmp.lt.s32.totalorder %s743_s26, %s738_s22 }
  0x1e   : > { %p741_p12 = pnand %p740_p10, %p739_p2 }
  0x1f   : > { %p746_p5 = por %p745_p3, %p744_p0 }
  0x20   : > { %p742_p13 = pneg %p741_p12 }
  0x22   : > { %p747_p11 = pnand %p746_p5, %p742_p13 }
  0x24   : > { %750 = shalt.err (!%p747_p11)
}
  0x25   : > { %s841_s30 = smov 256   ;;  %s842_s4 = smov 16  }
  0x26   : > { %642 = dma.hbm_to_vmem [thread:$0]  (!%p938_p9), %s136_s8, 512, %s138_s17, %s125_s19, %s841_s30, %s841_s30, %s842_s4  }
  0x27   : > { %149 = sbr.rel (%p903_p8) target bundleno = 223 (0xdf), region = 28  ;;  %s955_s5 = sand.u32 (!%p903_p8), 1, %s828_s10  }
  0x28   : > { %s532_s6 = sshll.u32 (!%p903_p8), %s955_s5, 5  ;;  %s152_s7 = scalar_lea.sflag (!%p903_p8), [#allocation3], %s955_s5 }
  0x29   : > { %s155_s14 = scalar_lea.vmem (!%p903_p8), [#allocation2], %s532_s6 }
  0x2c   : > { %811 = dma.done.wait (%p890_p4), %s152_s7, 512  }
  0x2d   : > { %813 = vsyncadd (%p890_p4), %s152_s7, 4294966784 }
  0x2e   : > { %815 = dma.done.wait (%p40_p1), [#allocation6], 2048  }
  0x2f   : > { %817 = vsyncadd (%p40_p1), [#allocation6], 4294965248  ;;  %v617_v0 = vld [vmem:[#allocation5 + $0x38] sm:$0xff]  ;;  %v616_v2 = vld [vmem:[#allocation5 + $0x30] sm:$0xff]  ;;  %s534_s15 = sshll.u32 %s955_s5, 4  ;;  %s626_s20 = sshll.u32 %s881_s13, 4 }
  0x30   : > { %v625_v1 = vld [vmem:[#allocation5 + $0x78] sm:$0xff]  ;;  %394 = vmatpush.bf16.msra.mxu0 %v617_v0  ;;  %v624_v3 = vld [vmem:[#allocation5 + $0x70] sm:$0xff]  ;;  %v615_v4 = vld [vmem:[#allocation5 + $0x28] sm:$0xff]  ;;  %s436_s18 = scalar_lea.hbm %s1040_s2, %s626_s20  ;;  %s181_s19 = scalar_lea.vmem [#allocation7], %s534_s15 }
  0x31   : > { %408 = vmatpush.bf16.msra.mxu1 %v625_v1  ;;  %v623_v5 = vld [vmem:[#allocation5 + $0x68] sm:$0xff]  ;;  %v184_v6 = vld [vmem:[%s155_s14] sm:$0xff]  ;;  %v186_v7 = vld [vmem:[%s155_s14 + $0x10] sm:$0xff]  ;;  %s437_s21 = sshll.u32 %s181_s19, 4  ;;  %s439_s22 = sshll.u32 %s436_s18, 4  ;;  %s438_s21 = int_to_ptr.vmem [resolvable:$true] %s437_s21  ;;  %s440_s22 = int_to_ptr.hbm [resolvable:$true] %s439_s22 }
  0x32   : > { %v535_v8 = vmul.f32 -1.442695, %v184_v6  ;;  %v537_v9 = vmul.f32 -1.442695, %v186_v7  ;;  %v185_v10 = vld [vmem:[%s155_s14 + $0x8] sm:$0xff]  ;;  %v187_v11 = vld [vmem:[%s155_s14 + $0x18] sm:$0xff] }
  0x33   : > { %v536_v12 = vmul.f32 -1.442695, %v185_v10  ;;  %v538_v13 = vmul.f32 -1.442695, %v187_v11  ;;  %v614_v14 = vld [vmem:[#allocation5 + $0x20] sm:$0xff]  ;;  %v613_v17 = vld [vmem:[#allocation5 + $0x18] sm:$0xff] }
  0x34   : > { %395 = vmatpush.bf16.msra.mxu0 %v616_v2  ;;  %690 = vpow2.f32 %v535_v8  ;;  %v622_v15 = vld [vmem:[#allocation5 + $0x60] sm:$0xff]  ;;  %v621_v18 = vld [vmem:[#allocation5 + $0x58] sm:$0xff]  ;;  %v612_v24 = vld [vmem:[#allocation5 + $0x10] sm:$0xff]  ;;  %s425_s24 = scalar_lea.sflag [#allocation4], %s955_s5  ;;  %s780_s25 = sshra.s32 %s440_s22, 4  ;;  %s781_s25 = int_to_ptr.hbm [resolvable:$true] %s780_s25 }
  0x35   : > { %409 = vmatpush.bf16.msra.mxu1 %v624_v3  ;;  %692 = vpow2.f32 %v537_v9  ;;  %v620_v25 = vld [vmem:[#allocation5 + $0x50] sm:$0xff]  ;;  %v611_v28 = vld [vmem:[#allocation5 + $0x8] sm:$0xff]  ;;  %v610_v38 = vld [vmem:[#allocation5] sm:$0xff]  ;;  %s782_s13 = scalar_lea.hbm %s781_s25, 16  ;;  %s786_s3 = scalar_lea.hbm %s1040_s2, 32 }
  0x36   : > { %694 = vpow2.f32 %v536_v12  ;;  %v619_v29 = vld [vmem:[#allocation5 + $0x48] sm:$0xff]  ;;  %v618_v39 = vld [vmem:[#allocation5 + $0x40] sm:$0xff]  ;;  %p783_p1 = scmp.ne.s32.totalorder %s781_s25, %s782_s13  ;;  %p787_p11 = scmp.lt.s32.totalorder %s781_s25, %s1040_s2 }
  0x37   : > { %696 = vpow2.f32 %v538_v13  ;;  %p788_p9 = scmp.lt.s32.totalorder %s786_s3, %s782_s13 }
  0x38   : > { %396 = vmatpush.bf16.msra.mxu0 %v615_v4  ;;  %p784_p4 = pnand %p783_p1, %p927_p7 }
  0x39   : > { %410 = vmatpush.bf16.msra.mxu1 %v623_v5  ;;  %p789_p2 = por %p788_p9, %p787_p11 }
  0x3a   : > { %v691_v16 = vpop.eup %690  ;;  %p785_p8 = pneg %p784_p4 }
  0x3b   : > { %v693_v19 = vpop.eup %692  ;;  %v200_v20 = vadd.f32 1.0, %v691_v16 }
  0x3c   : > { %397 = vmatpush.bf16.msra.mxu0 %v614_v14  ;;  %v695_v21 = vpop.eup %694  ;;  %v202_v22 = vadd.f32 1.0, %v693_v19  ;;  %p790_p10 = pnand %p789_p2, %p785_p8 }
  0x3d   : > { %411 = vmatpush.bf16.msra.mxu1 %v622_v15  ;;  %v697_v23 = vpop.eup %696  ;;  %698 = vrcp.f32 %v200_v20  ;;  %v201_v26 = vadd.f32 1.0, %v695_v21  ;;  %v213_v30 = vand.u32 2147483647, %v200_v20  ;;  %v215_v31 = vand.u32 2147483648, %v200_v20 }
  0x3e   : > { %700 = vrcp.f32 %v202_v22  ;;  %v967_v27 = vadd.f32 1.0, %v697_v23  ;;  %v243_v33 = vand.u32 2147483647, %v202_v22  ;;  %v245_v34 = vand.u32 2147483648, %v202_v22 }
  0x3f   : > { %702 = vrcp.f32 %v201_v26  ;;  %vm209_vm0 = vweird.f32 %v200_v20  ;;  %vm239_vm1 = vweird.f32 %v202_v22  ;;  %vm970_vm3 = vcmp.eq.f32.partialorder %v213_v30, 8.507059e+37 }
  0x40   : > { %398 = vmatpush.bf16.msra.mxu0 %v613_v17  ;;  %704 = vrcp.f32 %v967_v27  ;;  %v216_v42 = vor.u32 1.1754944e-38, %v215_v31  ;;  %vm974_vm5 = vcmp.eq.f32.partialorder %v243_v33, 8.507059e+37  ;;  %v246_v46 = vor.u32 1.1754944e-38, %v245_v34 }
  0x41   : > { %412 = vmatpush.bf16.msra.mxu1 %v621_v18  ;;  %vm224_vm6 = vweird.f32 %v201_v26  ;;  %v228_v50 = vand.u32 2147483647, %v201_v26  ;;  %v230_v53 = vand.u32 2147483648, %v201_v26  ;;  %vm254_vm8 = vweird.f32 %v967_v27 }
  0x42   : > { %v260_v58 = vand.u32 2147483648, %v967_v27  ;;  %v258_v61 = vand.u32 2147483647, %v967_v27 }
  0x43   : > { %v699_v32 = vpop.eup %698  ;;  %v231_v2 = vor.u32 1.1754944e-38, %v230_v53  ;;  %vm229_vm13 = vcmp.eq.f32.partialorder %v228_v50, 8.507059e+37 }
  0x44   : > { %399 = vmatpush.bf16.msra.mxu0 %v612_v24  ;;  %v701_v35 = vpop.eup %700  ;;  %v205_v36 = vmul.f32 %v699_v32, %v200_v20  ;;  %vm210_vm2 = vweird.f32 %v699_v32  ;;  %v261_v6 = vor.u32 1.1754944e-38, %v260_v58  ;;  %vm259_vm15 = vcmp.eq.f32.partialorder %v258_v61, 8.507059e+37 }
  0x45   : > { %413 = vmatpush.bf16.msra.mxu1 %v620_v25  ;;  %v235_v37 = vmul.f32 %v701_v35, %v202_v22  ;;  %v703_v43 = vpop.eup %702  ;;  %vm240_vm4 = vweird.f32 %v701_v35  ;;  %vm979_vm7 = vmor %vm209_vm0, %vm210_vm2 }
  0x46   : > { %v206_v40 = vsub.f32 1.0, %v205_v36  ;;  %v705_v47 = vpop.eup %704  ;;  %v220_v49 = vmul.f32 %v703_v43, %v201_v26  ;;  %vm987_vm9 = vmor %vm239_vm1, %vm240_vm4  ;;  %vm225_vm10 = vweird.f32 %v703_v43 }
  0x47   : > { %v236_v44 = vsub.f32 1.0, %v235_v37  ;;  %v250_v54 = vmul.f32 %v705_v47, %v967_v27  ;;  %vm255_vm11 = vweird.f32 %v705_v47  ;;  %vm226_vm12 = vmor %vm224_vm6, %vm225_vm10 }
  0x48   : > { %400 = vmatpush.bf16.msra.mxu0 %v611_v28  ;;  %v207_v48 = vmul.f32 %v699_v32, %v206_v40  ;;  %v221_v57 = vsub.f32 1.0, %v220_v49  ;;  %vm256_vm14 = vmor %vm254_vm8, %vm255_vm11 }
  0x49   : > { %414 = vmatpush.bf16.msra.mxu1 %v619_v29  ;;  %v237_v52 = vmul.f32 %v701_v35, %v236_v44  ;;  %v251_v60 = vsub.f32 1.0, %v250_v54 }
  0x4a   : > { %v208_v55 = vadd.f32 %v699_v32, %v207_v48  ;;  %v222_v63 = vmul.f32 %v703_v43, %v221_v57 }
  0x4b   : > { %v238_v59 = vadd.f32 %v701_v35, %v237_v52  ;;  %v252_v3 = vmul.f32 %v705_v47, %v251_v60 }
  0x4c   : > { %401 = vmatpush.bf16.msra.mxu0 %v610_v38  ;;  %v212_v62 = vsel %vm979_vm7, %v699_v32, %v208_v55  ;;  %v223_v5 = vadd.f32 %v703_v43, %v222_v63 }
  0x4d   : > { %415 = vmatpush.bf16.msra.mxu1 %v618_v39  ;;  %v217_v0 = vsel %vm970_vm3, %v216_v42, %v212_v62  ;;  %v242_v1 = vsel %vm987_vm9, %v701_v35, %v238_v59  ;;  %v253_v8 = vadd.f32 %v705_v47, %v252_v3 }
  0x4e   : > { %v247_v4 = vsel %vm974_vm5, %v246_v46, %v242_v1  ;;  %v227_v9 = vsel %vm226_vm12, %v703_v43, %v223_v5 }
  0x4f   : > { %v264_v7 = vpack.c.bf16 %v247_v4, %v217_v0  ;;  %v232_v10 = vsel %vm229_vm13, %v231_v2, %v227_v9  ;;  %v257_v11 = vsel %vm256_vm14, %v705_v47, %v253_v8 }
  0x50   : > { %v262_v12 = vsel %vm259_vm15, %v261_v6, %v257_v11 }
  0x51   : > { %402 = vmatmul.bf16.vlgmr.msra.gmra.mxu0 %v264_v7  ;;  %v265_v13 = vpack.c.bf16 %v262_v12, %v232_v10 }
  0x53   : > { %416 = vmatmul.bf16.vlgmr.msra.gmra.mxu1 %v265_v13 }
  0xce   : > { %v403_v14 = vpop.f32.mrf.mxu0 }
  0xd0   : > { %v417_v15 = vpop.f32.mrf.mxu1 }
  0xd1   : > { %v418_v16 = vadd.f32 %v417_v15, %v403_v14 }
  0xd3   : > { %422 = vst [vmem:[%s181_s19] sm:$0xff] %v418_v16 }
  0xd6   : > { %v405_v17 = vpop.f32.mrf.mxu0 }
  0xd8   : > { %v419_v18 = vpop.f32.mrf.mxu1 }
  0xd9   : > { %v420_v19 = vadd.f32 %v419_v18, %v405_v17 }
  0xdb   : > { %423 = vst [vmem:[%s181_s19 + $0x8] sm:$0xff] %v420_v19 }
  0xdc   : > { %793 = shalt.err (!%p790_p10)
}
  0xdd   : > { %s843_s5 = smov 128   ;;  %s844_s6 = smov 8  }
  0xde   : > { %633 = dma.vmem_to_hbm [thread:$0]  (%p927_p7), %s438_s21, 256, %s440_s22, %s425_s24, %s843_s5, %s843_s5, %s844_s6  }
  0xdf PF: > { %s454_s7 = sand.u32 1, %s824_s9   ;;  %p1054_p12 = scmp.ge.s32.totalorder %s836_s12, 2 }
  0xe0   : > { %s455_s14 = scalar_lea.sflag [#allocation4], %s454_s7 }
  0xe1   : > { %p644_p13 = pnand %p1054_p12, %p895_p6 }
  0xe3   : > { %p645_p0 = pneg %p644_p13 }
  0xe5   : > { %819 = dma.done.wait (%p645_p0), %s455_s14, 256  }
  0xe6   : > { %821 = vsyncadd (%p645_p0), %s455_s14, 4294967040  ;;  %p16_p3 = scmp.ge.s32.totalorder %s913_s23, 4   ;;  %s1055_s9 = smov %s828_s10 }
  0xe7   : > { %s1056_s10 = smov %s832_s11  ;;  %s1057_s11 = smov %s923_s28 }
  0xe8   : > { %s1058_s12 = smov %s913_s23  ;;  %18 = sbr.rel (!%p16_p3) target bundleno = 6 (0x6), region = 77 }
  0xed   :  { %461 = vsyncpa [#allocation3], 1 }
  0xee   :  { %463 = vsyncpa [#allocation3 + $0x1], 1 }
  0xef   :  { %464 = vsyncpa [#allocation6], 1 }
  0xf0   :  { %465 = vsyncpa [#allocation4], 1 }
  0xf1   :  { %467 = vsyncpa [#allocation4 + $0x1], 1 }

</bundles_post_ra>
